<compile_context>
chip_gen: v7x
topology: tpu7x:2x2x1
jax: 0.10.0
libtpu: 0.0.40
codegen_flags: <defaults>
</compile_context>

<pallas_src>
import math

import jax
import jax.numpy as jnp
from jax.experimental import pallas as pl
from jax.experimental.pallas import tpu as pltpu

LANE = 128
# Budget for the whole double-buffered pipeline, counted at padded-in-VMEM
# size.  12 MiB is under v5e's 16 MiB scoped default and far under v6e/v7x's
# 32 MiB, while still giving multi-MiB lane-dense tiles (already at the HBM
# roofline for a streaming add).
_VMEM_PIPELINE_BUDGET = 12 * 1024 * 1024


def _round_up(a: int, b: int) -> int:
    return -(-a // b) * b


def _sublane_multiple(dtype) -> int:
    # f32 -> 8 sublanes, bf16 -> 16, int8/fp8 -> 32 (sub-32-bit packs along sublanes).
    return 8 * max(1, 4 // jnp.dtype(dtype).itemsize)


def _padded_lane_group_bytes(rows: int, dtype) -> int:
    """Real VMEM bytes one (rows, 128) column-group of a block occupies."""
    dt = jnp.dtype(dtype)
    return _round_up(rows, _sublane_multiple(dt)) * LANE * dt.itemsize


def _pick_tile_n(n: int, b_rows: int, x_dtype, pe_dtype, out_dtype) -> int:
    """Pick the lane-dense tile width (multiple of 128) of the flattened T*D axis.

    Budgets the padded, double-buffered footprint of all three streams so that
    small-B sublane padding can never overshoot the scoped-VMEM default on any
    TPU generation.
    """
    per_group = 2 * (
        _padded_lane_group_bytes(b_rows, x_dtype)
        + _padded_lane_group_bytes(b_rows, out_dtype)
        + _padded_lane_group_bytes(1, pe_dtype)
    )
    budget_groups = max(1, _VMEM_PIPELINE_BUDGET // per_group)

    n_groups = pl.cdiv(n, LANE)
    # Keep >= 2 grid steps when possible so v7x's two TensorCores both get
    # work; harmless on single-core chips.
    if n_groups >= 2:
        budget_groups = min(budget_groups, max(1, n_groups // 2))
    tn_groups = min(n_groups, budget_groups)

    # Prefer an even split: largest multiple-of-128 tile that divides n
    # (no ragged / masked final block, balanced split across cores).
    if n % LANE == 0:
        for cand in range(tn_groups, 0, -1):
            if n_groups % cand == 0:
                tn_groups = cand
                break
    return tn_groups * LANE


def _pe_add_kernel(x_ref, pe_ref, o_ref):
    # x_ref: (B, TN) chunk of the flattened input.
    # pe_ref: (1, TN) matching chunk of the flattened PE table (VPU broadcasts
    #         it over the sublane/batch axis).
    # The add promotes dtypes exactly like PyTorch (bf16 + f32 -> f32).
    o_ref[...] = (x_ref[...] + pe_ref[...]).astype(o_ref.dtype)


def make_sinusoidal_pe(d_model: int, max_len: int = 1000) -> jnp.ndarray:
    """Deterministic buffer setup, identical to the PyTorch __init__."""
    position = jnp.arange(0, max_len, dtype=jnp.float32)[:, None]            # (max_len, 1)
    div_term = jnp.exp(
        jnp.arange(0, d_model, 2, dtype=jnp.float32) * (-math.log(10000.0) / d_model)
    )                                                                         # (d_model/2,)
    pe = jnp.zeros((max_len, d_model), dtype=jnp.float32)
    pe = pe.at[:, 0::2].set(jnp.sin(position * div_term))
    pe = pe.at[:, 1::2].set(jnp.cos(position * div_term))
    return pe                                                                 # (max_len, d_model)


def positional_encoding_forward(x: jnp.ndarray, pe_flat: jnp.ndarray) -> jnp.ndarray:
    """x: (B, T, D); pe_flat: (1, max_len*D) full flattened PE table.

    Returns x + pe[:T] broadcast over B, with PyTorch dtype promotion.
    """
    B, T, D = x.shape
    max_len = pe_flat.shape[1] // D
    assert T <= max_len, f"sequence length {T} exceeds positional-encoding max_len {max_len}"

    out_dtype = jnp.promote_types(x.dtype, pe_flat.dtype)

    n = T * D
    x_flat = x.reshape(B, n)                      # contiguous -> zero-copy view

    tn = _pick_tile_n(n, B, x.dtype, pe_flat.dtype, out_dtype)
    grid = (pl.cdiv(n, tn),)

    out_flat = pl.pallas_call(
        _pe_add_kernel,
        out_shape=jax.ShapeDtypeStruct((B, n), out_dtype),
        grid_spec=pltpu.PrefetchScalarGridSpec(
            num_scalar_prefetch=0,
            grid=grid,
            in_specs=[
                pl.BlockSpec((B, tn), lambda j: (0, j)),   # x: all batch rows, one T*D chunk
                pl.BlockSpec((1, tn), lambda j: (0, j)),   # pe: same chunk of the full table
            ],
            out_specs=pl.BlockSpec((B, tn), lambda j: (0, j)),
        ),
        compiler_params=pltpu.CompilerParams(
            dimension_semantics=("parallel",),             # independent chunks -> megacore shard
        ),
    )(x_flat, pe_flat)

    return out_flat.reshape(B, T, D)


class PositionalEncoding:
    """JAX/Pallas port of the PyTorch module: out = x + pe[:, :T, :]."""

    def __init__(self, d_model: int, max_len: int = 1000):
        self.d_model = d_model
        self.max_len = max_len
        pe = make_sinusoidal_pe(d_model, max_len)               # (max_len, d_model) f32
        # Hoisted out of the per-call path: one flat, lane-dense buffer.  The
        # forward never slices/casts/reshapes it; the grid just covers the
        # first T*D columns (row-major flattening of pe[:T] == first T*D
        # elements of the flattened full table).
        self.pe_flat = pe.reshape(1, max_len * d_model)

    def __call__(self, x: jnp.ndarray) -> jnp.ndarray:
        return positional_encoding_forward(x, self.pe_flat)


if __name__ == "__main__":
    B, T, D = 2, 8, 32
    MAX_LEN = 1000

    key = jax.random.PRNGKey(0)
    x = jax.random.normal(key, (B, T, D), dtype=jnp.float32)

    module = PositionalEncoding(D, MAX_LEN)
    out = jax.block_until_ready(module(x))

    # Plain-JAX reference (same math as the PyTorch module).
    pe_table = make_sinusoidal_pe(D, MAX_LEN)
    ref = x + pe_table[None, :T, :]

    assert out.shape == (B, T, D)
    assert out.dtype == ref.dtype
    assert jnp.allclose(out, ref, atol=1e-6, rtol=1e-6), "mismatch vs reference"

    print("KERNEL_OK")
</pallas_src>

<mosaic_0001>
module attributes {stable_mosaic.version = 11 : i64} {
  func.func @_pe_add_kernel(%arg0: i32, %arg1: memref<2x128xf32, #tpu.memory_space<vmem>>, %arg2: memref<1x128xf32, #tpu.memory_space<vmem>>, %arg3: memref<2x128xf32, #tpu.memory_space<vmem>>) attributes {dimension_semantics = [#tpu.dimension_semantics<parallel>], iteration_bounds = array<i64: 2>, scalar_prefetch = 0 : i64, scratch_operands = 0 : i64, tpu.core_type = #tpu.core_type<tc>, window_params = [{transform_indices = @transform_0, window_bounds = array<i64: 2, 128>}, {transform_indices = @transform_1, window_bounds = array<i64: 1, 128>}, {transform_indices = @transform_2, window_bounds = array<i64: 2, 128>}]} {
    %c0 = arith.constant 0 : index
    %c0_0 = arith.constant 0 : index
    %0 = vector.load %arg1[%c0, %c0_0] : memref<2x128xf32, #tpu.memory_space<vmem>>, vector<2x128xf32>
    %c0_1 = arith.constant 0 : index
    %c0_2 = arith.constant 0 : index
    %1 = vector.load %arg2[%c0_1, %c0_2] : memref<1x128xf32, #tpu.memory_space<vmem>>, vector<1x128xf32>
    %2 = vector.broadcast %1 : vector<1x128xf32> to vector<2x128xf32>
    %3 = arith.addf %0, %2 : vector<2x128xf32>
    %c0_3 = arith.constant 0 : index
    %c0_4 = arith.constant 0 : index
    %4 = vector.load %arg3[%c0_3, %c0_4] : memref<2x128xf32, #tpu.memory_space<vmem>>, vector<2x128xf32>
    tpu.vector_store %arg3[%c0_3, %c0_4], %3 {strides = array<i32>} : memref<2x128xf32, #tpu.memory_space<vmem>>, vector<2x128xf32>,
    return
  }
  func.func @transform_0(%arg0: i32) -> (i32, i32) {
    %c0_i32 = arith.constant 0 : i32
    %c0_i32_0 = arith.constant 0 : i32
    return %c0_i32, %arg0 : i32, i32
  }
  func.func @transform_1(%arg0: i32) -> (i32, i32) {
    %c0_i32 = arith.constant 0 : i32
    %c0_i32_0 = arith.constant 0 : i32
    return %c0_i32, %arg0 : i32, i32
  }
  func.func @transform_2(%arg0: i32) -> (i32, i32) {
    %c0_i32 = arith.constant 0 : i32
    %c0_i32_0 = arith.constant 0 : i32
    return %c0_i32, %arg0 : i32, i32
  }
}

</mosaic_0001>

<bundles_post_ra>
// kernel: tpu_custom_call.1
= control target key start
LH: loop header
LB: loop body
LE: loop exit
PB: predicated region body
PF: predicated region fallthrough
CT: control target
= control target key end

     0   :  { %7 = vsyncpa [#allocation3], 0  ;;  %s726_s0 = inlined_call_operand.hbm [shape: f32[2,256], index: 0, kind: input, shape index: {}]   ;;  %s727_s1 = inlined_call_operand.hbm [shape: f32[1,32000], index: 1, kind: input, shape index: {}]   ;;  %s728_s2 = inlined_call_operand.hbm [shape: f32[2,256], index: 2, kind: output, shape index: {}]  }
   0x1   :  { %9 = vsyncpa [#allocation3 + $0x1], 0 }
   0x2   :  { %10 = vsyncpa [#allocation6], 0 }
   0x3   :  { %12 = vsyncpa [#allocation6 + $0x1], 0 }
   0x4   :  { %13 = vsyncpa [#allocation4], 0 }
   0x5   :  { %15 = vsyncpa [#allocation4 + $0x1], 0  ;;  %s522_s9 = smov 0   ;;  %s524_s10 = smov 0  }
   0x6   :  { %s526_s11 = smov 0   ;;  %s528_s12 = smov 0  }
   0x7 LB: > { %s543_s13 = sadd.s32 4294967295, %s502_s12   ;;  %s307_s14 = sadd.s32 4294967294, %s502_s12   ;;  %s502_s12 = sphi %s528_s12, %s747_s12   ;;  %s498_s11 = sphi %s526_s11, %s746_s11   ;;  %s494_s10 = sphi %s524_s10, %s745_s10   ;;  %s490_s9 = sphi %s522_s9, %s744_s9  }
   0x8   : > { %s547_s15 = sadd.s32 1, %s502_s12   ;;  %s28_s16 = sadd.s32 1, %s498_s11 }
   0x9   : > { %s25_s17 = ssub.s32 %s502_s12, %s547_s15  ;;  %p35_p0 = scmp.ne.s32.totalorder %s498_s11, %s494_s10 }
   0xa   : > { %p26_p1 = scmp.eq.s32.totalorder %s25_s17, 0  ;;  %p36_p2 = scmp.eq.s32.totalorder %s502_s12, 0 }
   0xb   : > { %p41_p3 = scmp.ne.s32.totalorder %s494_s10, %s490_s9  ;;  %p42_p4 = scmp.eq.s32.totalorder %s543_s13, 0 }
   0xc   : > { %s559_s18 = scalar_select %p26_p1, %s498_s11, %s28_s16  }
   0xd   : > { %p561_p5 = por %p36_p2, %p35_p0  ;;  %p565_p6 = por %p42_p4, %p41_p3 }
   0xe   : > { %p91_p7 = scmp.eq.s32.totalorder %s543_s13, 1  ;;  %p97_p8 = scmp.eq.s32.totalorder %s307_s14, 1 }
   0xf   : > { %s732_s20 = scalar_select %p565_p6, 1, 0 }
  0x10   : > { %p338_p10 = scmp.lt.s32.totalorder %s502_s12, 2  ;;  %p572_p11 = por %p91_p7, %p35_p0 }
  0x11   : > { %p576_p12 = por %p97_p8, %p41_p3  ;;  %s581_s23 = sand.u32 1, %s498_s11  }
  0x12   : > { %s733_s21 = scalar_select %p572_p11, 1, 0 }
  0x13   : > { %s734_s22 = scalar_select %p576_p12, 1, 0 }
  0x14   : > { %s311_s24 = sshll.u32 %s502_s12, 5  ;;  %s310_s25 = sshll.u32 %s581_s23, 1 }
  0x15   : > { %s588_s28 = scalar_lea.hbm %s726_s0, %s311_s24  ;;  %s121_s29 = scalar_lea.vmem [#allocation2], %s310_s25 }
  0x16   : > { %s128_s30 = sshll.u32 %s121_s29, 4  ;;  %p592_p13 = pnand %p338_p10, %p561_p5  ;;  %s596_s30 = int_to_ptr.vmem [resolvable:$true] %s128_s30 }
  0x17   : > { %s118_s4 = scalar_lea.sflag [#allocation3], %s581_s23  ;;  %s372_s5 = scalar_lea.hbm %s588_s28, 32 }
  0x18   : > { %p373_p2 = scmp.ne.s32.totalorder %s588_s28, %s372_s5  ;;  %p374_p3 = pneg %p592_p13 }
  0x19   : > { %s377_s8 = scalar_lea.hbm %s726_s0, 64  ;;  %p378_p5 = scmp.lt.u32.totalorder %s588_s28, %s726_s0 }
  0x1a   : > { %p375_p4 = pnand %p374_p3, %p373_p2  ;;  %p379_p8 = scmp.lt.u32.totalorder %s377_s8, %s372_s5 }
  0x1b   : > { %p381_p9 = scmp.lt.u32.totalorder %s372_s5, %s588_s28 }
  0x1c   : > { %p376_p7 = pneg %p375_p4  ;;  %p380_p10 = por %p379_p8, %p378_p5 }
  0x1e   : > { %p382_p0 = por %p381_p9, %p380_p10 }
  0x20   : > { %p383_p1 = pnand %p382_p0, %p376_p7 }
  0x22   : > { %386 = shalt.err (!%p383_p1)
}
  0x23   : > { %s387_s17 = scalar_lea.vmem %s596_s30, 32  ;;  %s504_s19 = smov [#allocation2]  }
  0x24   : > { %p388_p2 = scmp.ne.s32.totalorder %s596_s30, %s387_s17  ;;  %s392_s24 = sshll.u32 %s504_s19, 4  ;;  %s393_s24 = int_to_ptr.vmem [resolvable:$false] %s392_s24 }
  0x25   : > { %s394_s25 = scalar_lea.vmem %s393_s24, 64  ;;  %p395_p11 = scmp.lt.s32.totalorder %s596_s30, %s393_s24 }
  0x26   : > { %p390_p4 = pnand %p388_p2, %p374_p3  ;;  %p396_p5 = scmp.lt.s32.totalorder %s394_s25, %s387_s17 }
  0x28   : > { %p391_p12 = pneg %p390_p4  ;;  %p397_p8 = por %p396_p5, %p395_p11 }
  0x2a   : > { %p398_p9 = pnand %p397_p8, %p391_p12 }
  0x2c   : > { %401 = shalt.err (!%p398_p9)
}
  0x2d   : > { %330 = dma.hbm_to_vmem [thread:$0]  (!%p592_p13), %s588_s28, 32, %s596_s30, %s118_s4  }
  0x2e   : > { %p736_p0 = scmp.lt.s32.totalorder %s502_s12, 3  ;;  %p737_p1 = scmp.ge.s32.totalorder %s502_s12, 1 }
  0x2f   : > { %s312_s27 = sshll.u32 %s502_s12, 4  ;;  %s138_s7 = scalar_lea.vmem [#allocation5], %s581_s23 }
  0x30   : > { %p630_p7 = pnand %p737_p1, %p736_p0  ;;  %s638_s6 = scalar_lea.hbm %s727_s1, %s312_s27 }
  0x31   : > { %s145_s8 = sshll.u32 %s138_s7, 4  ;;  %s136_s28 = scalar_lea.sflag [#allocation6], %s581_s23  ;;  %s146_s8 = int_to_ptr.vmem [resolvable:$true] %s145_s8 }
  0x32   : > { %s738_s26 = scalar_select %p630_p7, 1, 0 }
  0x33   : > { %s402_s30 = scalar_lea.hbm %s638_s6, 16  ;;  %s407_s16 = scalar_lea.hbm %s727_s1, 4000 }
  0x34   : > { %p403_p11 = scmp.ne.s32.totalorder %s638_s6, %s402_s30  ;;  %p408_p2 = scmp.lt.u32.totalorder %s638_s6, %s727_s1 }
  0x35   : > { %p409_p4 = scmp.lt.u32.totalorder %s407_s16, %s402_s30  ;;  %p411_p8 = scmp.lt.u32.totalorder %s402_s30, %s638_s6 }
  0x36   : > { %p405_p12 = pnand %p403_p11, %p374_p3 }
  0x37   : > { %p410_p5 = por %p409_p4, %p408_p2 }
  0x38   : > { %p406_p10 = pneg %p405_p12 }
  0x39   : > { %p412_p9 = por %p411_p8, %p410_p5 }
  0x3b   : > { %p413_p0 = pnand %p412_p9, %p406_p10 }
  0x3d   : > { %416 = shalt.err (!%p413_p0)
}
  0x3e   : > { %s417_s23 = scalar_lea.vmem %s146_s8, 16  ;;  %s505_s24 = smov [#allocation5]  }
  0x3f   : > { %p418_p1 = scmp.ne.s32.totalorder %s146_s8, %s417_s23  ;;  %s422_s25 = sshll.u32 %s505_s24, 4  ;;  %s423_s25 = int_to_ptr.vmem [resolvable:$false] %s422_s25 }
  0x40   : > { %s424_s27 = scalar_lea.vmem %s423_s25, 32  ;;  %p425_p6 = scmp.lt.s32.totalorder %s146_s8, %s423_s25 }
  0x41   : > { %p420_p11 = pnand %p418_p1, %p374_p3  ;;  %p426_p7 = scmp.lt.s32.totalorder %s424_s27, %s417_s23 }
  0x43   : > { %p421_p12 = pneg %p420_p11  ;;  %p427_p2 = por %p426_p7, %p425_p6 }
  0x45   : > { %p428_p4 = pnand %p427_p2, %p421_p12 }
  0x47   : > { %431 = shalt.err (!%p428_p4)
}
  0x48   : > { %333 = dma.hbm_to_vmem [thread:$0]  (!%p592_p13), %s638_s6, 16, %s146_s8, %s136_s28  }
  0x49   : > { %p739_p10 = scmp.ne.s32.totalorder %s738_s26, 0 }
  0x4a   : > { %s664_s29 = sand.u32 (!%p739_p10), 1, %s494_s10   ;;  %p740_p3 = scmp.ne.s32.totalorder (!%p739_p10), %s732_s20, 0 }
  0x4b   : > { %154 = sbr.rel (%p739_p10) target bundleno = 111 (0x6f), region = 28  ;;  %s314_s5 = sshll.u32 (!%p739_p10), %s664_s29, 1 }
  0x4c   : > { %s157_s7 = scalar_lea.sflag (!%p739_p10), [#allocation3], %s664_s29  ;;  %s160_s30 = scalar_lea.vmem (!%p739_p10), [#allocation2], %s314_s5 }
  0x52   : > { %477 = dma.done.wait (%p740_p3), %s157_s7, 32  }
  0x53   : > { %479 = vsyncadd (%p740_p3), %s157_s7, 4294967264  ;;  %s166_s3 = scalar_lea.sflag [#allocation6], %s664_s29  ;;  %s168_s26 = scalar_lea.vmem [#allocation5], %s664_s29 }
  0x54   : > { %481 = dma.done.wait (%p740_p3), %s166_s3, 16  }
  0x55   : > { %483 = vsyncadd (%p740_p3), %s166_s3, 4294967280  ;;  %s192_s6 = scalar_lea.vmem [#allocation7], %s314_s5  ;;  %s318_s28 = sshll.u32 %s543_s13, 5  ;;  %v193_v0 = vld [vmem:[%s160_s30] sm:$0x3] }
  0x56   : > { %s217_s8 = sshll.u32 %s192_s6, 4  ;;  %v316_v1 = vld [vmem:[%s168_s26] ss:$0 sm:$0xff]  ;;  %s684_s16 = scalar_lea.hbm %s728_s2, %s318_s28  ;;  %s679_s8 = int_to_ptr.vmem [resolvable:$true] %s217_s8 }
  0x57   : > { %v201_v2 = vadd.f32 %v316_v1, %v193_v0  ;;  %s204_s20 = scalar_lea.sflag [#allocation4], %s664_s29  ;;  %s432_s17 = scalar_lea.vmem %s679_s8, 32 }
  0x58   : > { %p433_p6 = scmp.ne.s32.totalorder %s679_s8, %s432_s17  ;;  %p741_p13 = scmp.ne.s32.totalorder %s733_s21, 0 }
  0x59   : > { %202 = vst [vmem:[%s192_s6] sm:$0x3] %v201_v2  ;;  %s506_s13 = smov [#allocation7]  }
  0x5a   : > { %p434_p7 = pnand %p433_p6, %p741_p13  ;;  %s436_s19 = sshll.u32 %s506_s13, 4  ;;  %s437_s19 = int_to_ptr.vmem [resolvable:$false] %s436_s19 }
  0x5b   : > { %s438_s23 = scalar_lea.vmem %s437_s19, 64  ;;  %p439_p8 = scmp.lt.s32.totalorder %s679_s8, %s437_s19 }
  0x5c   : > { %p435_p5 = pneg %p434_p7  ;;  %p440_p9 = scmp.lt.s32.totalorder %s438_s23, %s432_s17 }
  0x5e   : > { %p441_p0 = por %p440_p9, %p439_p8 }
  0x60   : > { %p442_p1 = pnand %p441_p0, %p435_p5 }
  0x62   : > { %445 = shalt.err (!%p442_p1)
}
  0x63   : > { %s446_s24 = scalar_lea.hbm %s684_s16, 32  ;;  %s450_s29 = scalar_lea.hbm %s728_s2, 64 }
  0x64   : > { %p447_p11 = scmp.ne.s32.totalorder %s684_s16, %s446_s24  ;;  %p451_p4 = scmp.lt.u32.totalorder %s684_s16, %s728_s2 }
  0x65   : > { %p452_p10 = scmp.lt.u32.totalorder %s450_s29, %s446_s24  ;;  %p454_p6 = scmp.lt.u32.totalorder %s446_s24, %s684_s16 }
  0x66   : > { %p448_p12 = pnand %p447_p11, %p741_p13 }
  0x67   : > { %p453_p3 = por %p452_p10, %p451_p4 }
  0x68   : > { %p449_p2 = pneg %p448_p12 }
  0x69   : > { %p455_p7 = por %p454_p6, %p453_p3 }
  0x6b   : > { %p456_p5 = pnand %p455_p7, %p449_p2 }
  0x6d   : > { %459 = shalt.err (!%p456_p5)
}
  0x6e   : > { %325 = dma.vmem_to_hbm [thread:$0]  (%p741_p13), %s679_s8, 32, %s684_s16, %s204_s20  }
  0x6f PF: > { %s229_s30 = sand.u32 1, %s490_s9   ;;  %p742_p8 = scmp.ne.s32.totalorder %s734_s22, 0 }
  0x70   : > { %p743_p9 = scmp.ge.s32.totalorder %s502_s12, 2  ;;  %s230_s3 = scalar_lea.sflag [#allocation4], %s229_s30 }
  0x72   : > { %p335_p0 = pnand %p743_p9, %p742_p8 }
  0x74   : > { %485 = dma.done.wait (!%p335_p0), %s230_s3, 32  }
  0x75   : > { %487 = vsyncadd (!%p335_p0), %s230_s3, 4294967264  ;;  %p18_p1 = scmp.ge.s32.totalorder %s547_s15, 4   ;;  %s744_s9 = smov %s494_s10 }
  0x76   : > { %s745_s10 = smov %s498_s11  ;;  %s746_s11 = smov %s559_s18 }
  0x77   : > { %s747_s12 = smov %s547_s15  ;;  %20 = sbr.rel (!%p18_p1) target bundleno = 7 (0x7), region = 86 }
  0x7e   :  { %235 = vsyncpa [#allocation3], 1 }
  0x7f   :  { %237 = vsyncpa [#allocation3 + $0x1], 1 }
  0x80   :  { %238 = vsyncpa [#allocation6], 1 }
  0x81   :  { %240 = vsyncpa [#allocation6 + $0x1], 1 }
  0x82   :  { %241 = vsyncpa [#allocation4], 1 }
  0x83   :  { %243 = vsyncpa [#allocation4 + $0x1], 1 }

</bundles_post_ra>
